<compile_context>
chip_gen: v6e
topology: v6e:2x2x1
jax: 0.10.0
libtpu: 0.0.40
codegen_flags: <defaults>
</compile_context>

<pallas_src>
import jax
import jax.numpy as jnp
from jax.experimental import pallas as pl
from jax.experimental.pallas import tpu as pltpu


def _norm_by_const_kernel(x_ref, scale_ref, o_ref):
    # One vmul per vreg; (1,1,L) scale broadcasts over the sublane (row) axis.
    o_ref[...] = x_ref[...] * scale_ref[...]


def _sublane_multiple(dtype):
    # Sublane packing granularity per dtype width (f32 -> 8, bf16 -> 16, i8 -> 32).
    return {4: 8, 2: 16, 1: 32}.get(jnp.dtype(dtype).itemsize, 8)


def norm_by_constant(x, const, static_size, *, target_block_bytes=2 * 1024 * 1024):
    """Pallas equivalent of NormByConstant.forward.

    Returns x with x[..., static_size:] scaled by 1/const (multiplication by a
    precomputed reciprocal; differs from true division by <~2 ulp).
    """
    B, S, F = x.shape
    dtype = x.dtype

    # Per-feature scale: 1.0 for the static prefix, 1/const afterwards.
    feat = jnp.arange(F, dtype=jnp.int32)
    scale_f = jnp.where(feat >= static_size, 1.0 / float(const), 1.0).astype(dtype)

    # Lane-dense layout: fold small F into a 128-wide lane axis when possible
    # so output stores are full-width vst instead of masked partial stores.
    lane_dense = (F < 128) and (128 % F == 0) and ((S * F) % 128 == 0)
    if lane_dense:
        L = 128
        R = (S * F) // 128
        x_k = x.reshape(B, R, L)
        scale_row = jnp.tile(scale_f, L // F).reshape(1, 1, L)
    else:
        L = F
        R = S
        x_k = x
        scale_row = scale_f.reshape(1, 1, L)

    # Row tiling: ~target_block_bytes per block; with in + out double-buffered
    # that's ~4x in VMEM, well inside the scoped defaults on v5e/v6e/v7x.
    itemsize = jnp.dtype(dtype).itemsize
    row_bytes = L * itemsize
    ts = max(1, target_block_bytes // row_bytes)
    if ts >= R:
        ts = R  # full-extent block is always layout-legal
    else:
        mult = _sublane_multiple(dtype)
        ts = max(mult, (ts // mult) * mult)
        ts = min(ts, R)

    grid = (B, pl.cdiv(R, ts))

    out = pl.pallas_call(
        _norm_by_const_kernel,
        out_shape=jax.ShapeDtypeStruct((B, R, L), dtype),
        grid_spec=pltpu.PrefetchScalarGridSpec(
            num_scalar_prefetch=0,
            grid=grid,
            in_specs=[
                pl.BlockSpec((1, ts, L), lambda b, r: (b, r, 0)),
                pl.BlockSpec((1, 1, L), lambda b, r: (0, 0, 0)),
            ],
            out_specs=pl.BlockSpec((1, ts, L), lambda b, r: (b, r, 0)),
        ),
        input_output_aliases={0: 0},  # donate x -> out (in-place-like semantics)
        compiler_params=pltpu.CompilerParams(
            dimension_semantics=("parallel", "parallel"),
        ),
    )(x_k, scale_row)

    return out.reshape(B, S, F) if lane_dense else out


if __name__ == "__main__":
    # NormByConstant has no learned parameters -- just the constants below.
    const = 10.0
    static_size = 8

    key = jax.random.PRNGKey(0)
    B, S, F = 2, 8, 32
    x = jax.random.normal(key, (B, S, F), dtype=jnp.float32)

    # Reference (pure JAX) mirroring the PyTorch in-place slice divide.
    ref = x.at[..., static_size:].divide(const)

    out = norm_by_constant(x, const, static_size)
    out = jax.block_until_ready(out)

    assert out.shape == x.shape and out.dtype == x.dtype
    assert jnp.allclose(out, ref, atol=1e-6, rtol=1e-6)

    print("KERNEL_OK")
</pallas_src>

<mosaic_0001>
module attributes {stable_mosaic.version = 11 : i64} {
  func.func @_norm_by_const_kernel(%arg0: i32, %arg1: i32, %arg2: memref<1x2x128xf32, #tpu.memory_space<vmem>>, %arg3: memref<1x1x128xf32, #tpu.memory_space<vmem>>, %arg4: memref<1x2x128xf32, #tpu.memory_space<vmem>>) attributes {dimension_semantics = [#tpu.dimension_semantics<parallel>, #tpu.dimension_semantics<parallel>], iteration_bounds = array<i64: 2, 1>, scalar_prefetch = 0 : i64, scratch_operands = 0 : i64, tpu.core_type = #tpu.core_type<tc>, window_params = [{transform_indices = @transform_0, window_bounds = array<i64: 1, 2, 128>}, {pipeline_mode = #tpu.pipeline_mode<synchronous>, transform_indices = @transform_1, window_bounds = array<i64: 1, 1, 128>}, {transform_indices = @transform_2, window_bounds = array<i64: 1, 2, 128>}]} {
    %c0 = arith.constant 0 : index
    %c0_0 = arith.constant 0 : index
    %c0_1 = arith.constant 0 : index
    %0 = vector.load %arg2[%c0, %c0_0, %c0_1] : memref<1x2x128xf32, #tpu.memory_space<vmem>>, vector<1x2x128xf32>
    %c0_2 = arith.constant 0 : index
    %c0_3 = arith.constant 0 : index
    %c0_4 = arith.constant 0 : index
    %1 = vector.load %arg3[%c0_2, %c0_3, %c0_4] : memref<1x1x128xf32, #tpu.memory_space<vmem>>, vector<1x1x128xf32>
    %2 = vector.broadcast %1 : vector<1x1x128xf32> to vector<1x2x128xf32>
    %3 = arith.mulf %0, %2 : vector<1x2x128xf32>
    %c0_5 = arith.constant 0 : index
    %c0_6 = arith.constant 0 : index
    %c0_7 = arith.constant 0 : index
    %4 = vector.load %arg4[%c0_5, %c0_6, %c0_7] : memref<1x2x128xf32, #tpu.memory_space<vmem>>, vector<1x2x128xf32>
    tpu.vector_store %arg4[%c0_5, %c0_6, %c0_7], %3 {strides = array<i32>} : memref<1x2x128xf32, #tpu.memory_space<vmem>>, vector<1x2x128xf32>,
    return
  }
  func.func @transform_0(%arg0: i32, %arg1: i32) -> (i32, i32, i32) {
    %c0_i32 = arith.constant 0 : i32
    %c0_i32_0 = arith.constant 0 : i32
    return %arg0, %arg1, %c0_i32 : i32, i32, i32
  }
  func.func @transform_1(%arg0: i32, %arg1: i32) -> (i32, i32, i32) {
    %c0_i32 = arith.constant 0 : i32
    %c0_i32_0 = arith.constant 0 : i32
    %c0_i32_1 = arith.constant 0 : i32
    %c0_i32_2 = arith.constant 0 : i32
    return %c0_i32, %c0_i32_0, %c0_i32_1 : i32, i32, i32
  }
  func.func @transform_2(%arg0: i32, %arg1: i32) -> (i32, i32, i32) {
    %c0_i32 = arith.constant 0 : i32
    %c0_i32_0 = arith.constant 0 : i32
    return %arg0, %arg1, %c0_i32 : i32, i32, i32
  }
}

</mosaic_0001>

<bundles_post_ra>
// kernel: tpu_custom_call.1
= control target key start
LH: loop header
LB: loop body
LE: loop exit
PB: predicated region body
PF: predicated region fallthrough
CT: control target
= control target key end

     0   :  { %7 = vsyncpa [#allocation3], 0  ;;  %s621_s0 = inlined_call_operand.hbm [shape: f32[2,2,128], index: 0, kind: input, shape index: {}, may-alias: {0,2}]   ;;  %s622_s1 = inlined_call_operand.vmem [shape: f32[1,1,128], index: 1, kind: input, shape index: {}]   ;;  %s623_s2 = inlined_call_operand.hbm [shape: f32[2,2,128], index: 2, kind: output, shape index: {}, may-alias: {0,2}]  }
   0x1   :  { %9 = vsyncpa [#allocation3 + $0x1], 0 }
   0x2   :  { %10 = vsyncpa [#allocation4], 0 }
   0x3   :  { %12 = vsyncpa [#allocation4 + $0x1], 0  ;;  %s484_s9 = smov 0   ;;  %s486_s10 = smov 0  }
   0x4   :  { %s488_s11 = smov 0   ;;  %s490_s12 = smov 0  }
   0x5   :  { %s492_s13 = smov 0   ;;  %s494_s14 = smov 0  }
   0x6 LB: > { %s281_s15 = sadd.s32 4294967295, %s465_s14   ;;  %s282_s16 = sadd.s32 4294967294, %s465_s14   ;;  %s465_s14 = sphi %s494_s14, %s18_s14   ;;  %s461_s13 = sphi %s492_s13, %s635_s13   ;;  %s457_s12 = sphi %s490_s12, %s634_s12   ;;  %s453_s11 = sphi %s488_s11, %s633_s11   ;;  %s449_s10 = sphi %s486_s10, %s632_s10   ;;  %s445_s9 = sphi %s484_s9, %s631_s9  }
   0x7   : > { %s30_s17 = sadd.s32 1, %s461_s13  ;;  %s39_s18 = sadd.s32 1, %s453_s11 }
   0x8   : > { %p32_p0 = scmp.ge.s32.totalorder %s30_s17, 2  ;;  %p46_p1 = scmp.ne.s32.totalorder %s453_s11, %s449_s10 }
   0x9   : > { %p47_p2 = scmp.eq.s32.totalorder %s465_s14, 0  ;;  %p52_p3 = scmp.ne.s32.totalorder %s449_s10, %s445_s9 }
   0xa   : > { %s637_s17 = smov (%p32_p0, %s30_s17), 0  ;;  %p53_p5 = scmp.eq.s32.totalorder %s281_s15, 0 }
   0xb   : > { %p525_p4 = por %p47_p2, %p46_p1  ;;  %s34_s20 = ssub.s32 %s461_s13, %s637_s17 }
   0xc   : > { %p99_p6 = scmp.eq.s32.totalorder %s281_s15, 1  ;;  %p37_p7 = scmp.eq.s32.totalorder %s34_s20, 0 }
   0xd   : > { %p531_p8 = por %p53_p5, %p52_p3  ;;  %p105_p10 = scmp.eq.s32.totalorder %s282_s16, 1 }
   0xe   : > { %p535_p9 = por %p99_p6, %p46_p1  ;;  %p307_p13 = scmp.lt.s32.totalorder %s465_s14, 2 }
   0xf   : > { %s540_s23 = scalar_select %p37_p7, %s453_s11, %s39_s18  }
  0x10   : > { %p542_p11 = por %p105_p10, %p52_p3  ;;  %s128_s25 = sand.u32 1, %s453_s11  }
  0x11   : > { %s285_s26 = sshll.u32 %s128_s25, 1  ;;  %s286_s27 = sshll.u32 %s461_s13, 5 }
  0x12   : > { %s627_s24 = scalar_select %p542_p11, 1, 0 }
  0x13   : > { %s138_s30 = scalar_lea.hbm %s621_s0, %s286_s27  ;;  %s132_s3 = scalar_lea.vmem [#allocation2], %s285_s26 }
  0x14   : > { %s140_s4 = sshll.u32 %s132_s3, 4  ;;  %p555_p0 = pnand %p307_p13, %p525_p4  ;;  %s141_s4 = int_to_ptr.vmem [resolvable:$true] %s140_s4 }
  0x15   : > { %p287_p1 = scmp.ge.s32.totalorder %s465_s14, 1  ;;  %p145_p2 = scmp.lt.s32.totalorder %s465_s14, 3 }
  0x16   : > { %s129_s6 = scalar_lea.sflag [#allocation3], %s128_s25  ;;  %p359_p3 = pneg %p555_p0 }
  0x17   : > { %s370_s7 = scalar_lea.vmem %s141_s4, 32  ;;  %s467_s8 = smov [#allocation2]  }
  0x18   : > { %p371_p5 = scmp.ne.s32.totalorder %s141_s4, %s370_s7  ;;  %s375_s15 = sshll.u32 %s467_s8, 4  ;;  %s376_s15 = int_to_ptr.vmem [resolvable:$false] %s375_s15 }
  0x19   : > { %s377_s16 = scalar_lea.vmem %s376_s15, 64  ;;  %p378_p10 = scmp.lt.s32.totalorder %s141_s4, %s376_s15 }
  0x1a   : > { %p373_p6 = pnand %p371_p5, %p359_p3  ;;  %p379_p12 = scmp.lt.s32.totalorder %s377_s16, %s370_s7 }
  0x1c   : > { %p374_p7 = pneg %p373_p6  ;;  %p380_p4 = por %p379_p12, %p378_p10 }
  0x1e   : > { %p381_p13 = pnand %p380_p4, %p374_p7 }
  0x20   : > { %384 = shalt.err (!%p381_p13)
}
  0x21   : > { %302 = dma.hbm_to_vmem [thread:$0]  (!%p555_p0), %s138_s30, 32, %s141_s4, %s129_s6  }
  0x22   : > { %p146_p11 = pnand %p287_p1, %p145_p2 }
  0x23   : > { %s570_s18 = sand.u32 (!%p146_p11), 1, %s449_s10  }
  0x24   : > { %149 = sbr.rel (%p146_p11) target bundleno = 66 (0x42), region = 28  ;;  %s288_s19 = sshll.u32 (!%p146_p11), %s570_s18, 1 }
  0x25   : > { %s152_s20 = scalar_lea.sflag (!%p146_p11), [#allocation3], %s570_s18  ;;  %s155_s25 = scalar_lea.vmem (!%p146_p11), [#allocation2], %s288_s19 }
  0x29   : > { %436 = dma.done.wait (%p531_p8), %s152_s20, 32  }
  0x2a   : > { %438 = vsyncadd (%p531_p8), %s152_s20, 4294967264  ;;  %s175_s26 = scalar_lea.vmem [#allocation5], %s288_s19  ;;  %s292_s28 = sshll.u32 %s457_s12, 5  ;;  %v176_v0 = vld [vmem:[%s155_s25] sm:$0x3] }
  0x2b   : > { %s201_s27 = sshll.u32 %s175_s26, 4  ;;  %v290_v1 = vld [vmem:[%s622_s1] ss:$0 sm:$0xff]  ;;  %s199_s5 = scalar_lea.hbm %s623_s2, %s292_s28  ;;  %s202_s27 = int_to_ptr.vmem [resolvable:$true] %s201_s27 }
  0x2c   : > { %v184_v2 = vmul.f32 %v290_v1, %v176_v0  ;;  %s187_s21 = scalar_lea.sflag [#allocation4], %s570_s18  ;;  %s385_s6 = scalar_lea.vmem %s202_s27, 32 }
  0x2d   : > { %p386_p8 = scmp.ne.s32.totalorder %s202_s27, %s385_s6  ;;  %s468_s7 = smov [#allocation5]  }
  0x2e   : > { %185 = vst [vmem:[%s175_s26] sm:$0x3] %v184_v2  ;;  %s389_s12 = sshll.u32 %s468_s7, 4  ;;  %s390_s12 = int_to_ptr.vmem [resolvable:$false] %s389_s12 }
  0x2f   : > { %p387_p11 = pnand %p386_p8, %p535_p9  ;;  %s391_s8 = scalar_lea.vmem %s390_s12, 64 }
  0x30   : > { %p392_p0 = scmp.lt.s32.totalorder %s202_s27, %s390_s12  ;;  %p393_p1 = scmp.lt.s32.totalorder %s391_s8, %s385_s6 }
  0x31   : > { %p388_p12 = pneg %p387_p11 }
  0x32   : > { %p394_p2 = por %p393_p1, %p392_p0 }
  0x34   : > { %p395_p3 = pnand %p394_p2, %p388_p12 }
  0x36   : > { %398 = shalt.err (!%p395_p3)
}
  0x37   : > { %s399_s15 = scalar_lea.hbm %s199_s5, 32  ;;  %s403_s19 = scalar_lea.hbm %s623_s2, 64 }
  0x38   : > { %p400_p5 = scmp.ne.s32.totalorder %s199_s5, %s399_s15  ;;  %p404_p10 = scmp.lt.s32.totalorder %s199_s5, %s623_s2 }
  0x39   : > { %p405_p4 = scmp.lt.s32.totalorder %s403_s19, %s399_s15 }
  0x3a   : > { %p401_p6 = pnand %p400_p5, %p535_p9 }
  0x3b   : > { %p406_p13 = por %p405_p4, %p404_p10 }
  0x3c   : > { %p402_p7 = pneg %p401_p6 }
  0x3e   : > { %p407_p8 = pnand %p406_p13, %p402_p7 }
  0x40   : > { %410 = shalt.err (!%p407_p8)
}
  0x41   : > { %297 = dma.vmem_to_hbm [thread:$0]  (%p535_p9), %s202_s27, 32, %s199_s5, %s187_s21  }
  0x42 PF: > { %s213_s26 = sand.u32 1, %s445_s9   ;;  %p629_p11 = scmp.ne.s32.totalorder %s627_s24, 0 }
  0x43   : > { %p630_p12 = scmp.ge.s32.totalorder %s465_s14, 2  ;;  %s214_s28 = scalar_lea.sflag [#allocation4], %s213_s26 }
  0x45   : > { %p304_p0 = pnand %p630_p12, %p629_p11 }
  0x47   : > { %p305_p1 = pneg %p304_p0 }
  0x49   : > { %440 = dma.done.wait (%p305_p1), %s214_s28, 32  }
  0x4a   : > { %442 = vsyncadd (%p305_p1), %s214_s28, 4294967264  ;;  %s18_s14 = sadd.s32 1, %s465_s14   ;;  %s631_s9 = smov %s449_s10 }
  0x4b   : > { %p15_p2 = scmp.ge.s32.totalorder %s18_s14, 4   ;;  %s632_s10 = smov %s453_s11 }
  0x4c   : > { %s633_s11 = smov %s540_s23  ;;  %s634_s12 = smov %s461_s13 }
  0x4d   : > { %s635_s13 = smov %s637_s17  ;;  %17 = sbr.rel (!%p15_p2) target bundleno = 6 (0x6), region = 73 }
  0x52   :  { %219 = vsyncpa [#allocation3], 1 }
  0x53   :  { %221 = vsyncpa [#allocation3 + $0x1], 1 }
  0x54   :  { %222 = vsyncpa [#allocation4], 1 }
  0x55   :  { %224 = vsyncpa [#allocation4 + $0x1], 1 }

</bundles_post_ra>
